<compile_context>
chip_gen: v7x
topology: tpu7x:2x2x1
jax: 0.10.0
libtpu: 0.0.40
codegen_flags: <defaults>
</compile_context>

<pallas_src>
import functools

import jax
import jax.numpy as jnp
from jax.experimental import pallas as pl
from jax.experimental.pallas import tpu as pltpu


_VMEM_LIMIT_BYTES = 48 * 1024 * 1024   # raised scoped-VMEM cap; safe on v5e/v6e/v7x


def _round_up(x, m):
    return ((x + m - 1) // m) * m


def _cdiv(a, b):
    return (a + b - 1) // b


def _choose_tile_n(P, N, D, itemsize=4, target_bytes=6 << 20, min_tiles=4):
    """Node-tile size: multiple of 8 sublanes, ~6 MiB of f32 embeds per tile.

    Double-buffered tile + in-kernel intermediates stay well under the 48 MiB
    scoped-VMEM cap on every generation (incl. v7x's 64 MiB physical VMEM).
    For large N the tile is clamped so there are >= min_tiles grid steps and
    the "parallel" grids can shard across v7x's two TensorCores.
    """
    n8 = _round_up(N, 8)
    rows = max(8, target_bytes // max(1, P * D * itemsize))
    tile = max(8, min(_round_up(rows, 8), n8))
    if N >= min_tiles * 512:
        tile = min(tile, max(8, _round_up(_cdiv(N, min_tiles), 8)))
    return int(tile)


# ---------------------------------------------------------------------------
# Pass 1: per-view, per-tile partial attention scores (parallel over N tiles)
# ---------------------------------------------------------------------------
def _scores_kernel(embeds_ref, wt_ref, b_ref, att_ref, psum_ref, *, n_true, tile_n):
    i = pl.program_id(0)
    P, TN, D = embeds_ref.shape

    # One collapsed bf16 MXU matmul (f32 accumulation); tanh on the EUP.
    # TN is a multiple of 8, so the leading-dim collapse is sublane-aligned.
    x = embeds_ref[...].astype(jnp.bfloat16).reshape(P * TN, D)
    h = jnp.dot(x, wt_ref[...], preferred_element_type=jnp.float32) + b_ref[...]
    t = jnp.tanh(h).reshape(P, TN, D)

    # att dot as a lane-dense VPU multiply + reduce (no width-1 MXU matvec).
    weighted = t * att_ref[...].reshape(1, 1, D)

    def _store(w):
        s = jnp.sum(w, axis=1)                                   # (P, D) node-reduce
        psum_ref[...] = jnp.sum(s, axis=1, keepdims=True).reshape(1, P, 1)

    if n_true % tile_n == 0:
        _store(weighted)
    else:
        last = pl.num_programs(0) - 1

        @pl.when(i < last)
        def _full_tile():
            _store(weighted)

        @pl.when(i == last)
        def _ragged_tile():
            # Zero contributions from out-of-bounds (ragged-tail) node rows.
            node = i * TN + jax.lax.broadcasted_iota(jnp.int32, (1, TN, 1), 1)
            _store(jnp.where(node < n_true, weighted, 0.0))


# ---------------------------------------------------------------------------
# Pass 2: z = sum_p beta_p * embeds_p   (parallel over N tiles)
# ---------------------------------------------------------------------------
def _weighted_sum_kernel(beta_ref, embeds_ref, z_ref):
    P = embeds_ref.shape[0]
    # P is tiny & static: unrolled scalar FMAs on the VPU, no K=P MXU matmul.
    acc = embeds_ref[0] * beta_ref[0, 0]
    for p in range(1, P):
        acc = acc + embeds_ref[p] * beta_ref[p, 0]
    z_ref[...] = acc.astype(z_ref.dtype)


def aggregator_forward(embeds, fc_weight, fc_bias, att, *, tile_n=None):
    P, N, D = embeds.shape
    embeds = embeds.astype(jnp.float32)

    if tile_n is None:
        tile_n = _choose_tile_n(P, N, D)
    tile_n = int(max(8, _round_up(min(int(tile_n), _round_up(N, 8)), 8)))
    num_tiles = _cdiv(N, tile_n)

    # Host-side one-time layout/dtype prep (done by XLA once):
    w_t = fc_weight.astype(jnp.float32).T.astype(jnp.bfloat16)   # (D, D) bf16 for MXU
    b_row = fc_bias.astype(jnp.float32).reshape(1, D)            # (1, D)
    att_row = att.astype(jnp.float32).reshape(1, D)              # (1, D)

    # ---- Pass 1: per-tile partial sums of att . tanh(x W^T + b) ------------
    scores_cost = pl.CostEstimate(
        flops=int(2 * P * N * D * D + 3 * P * N * D),
        transcendentals=int(P * N * D),
        bytes_accessed=int(4 * P * N * D + 2 * D * D + 8 * D + 4 * num_tiles * P),
    )
    psums = pl.pallas_call(
        functools.partial(_scores_kernel, n_true=N, tile_n=tile_n),
        out_shape=jax.ShapeDtypeStruct((num_tiles, P, 1), jnp.float32),
        grid_spec=pltpu.PrefetchScalarGridSpec(
            num_scalar_prefetch=0,
            grid=(num_tiles,),
            in_specs=[
                pl.BlockSpec((P, tile_n, D), lambda i: (0, i, 0)),  # embeds tile
                pl.BlockSpec((D, D), lambda i: (0, 0)),             # W^T (bf16, resident)
                pl.BlockSpec((1, D), lambda i: (0, 0)),             # bias row
                pl.BlockSpec((1, D), lambda i: (0, 0)),             # att row
            ],
            out_specs=pl.BlockSpec((1, P, 1), lambda i: (i, 0, 0)),  # per-tile partials
        ),
        compiler_params=pltpu.CompilerParams(
            dimension_semantics=("parallel",),          # megacore-shardable on v7x
            vmem_limit_bytes=_VMEM_LIMIT_BYTES),
        cost_estimate=scores_cost,
    )(embeds, w_t, b_row, att_row)

    # Tiny (P,)-sized mean + softmax combine (negligible; keeps pass 1 free of
    # a serialized finalize step).
    scores = jnp.sum(psums, axis=0).reshape(P) * (1.0 / N)
    beta = jax.nn.softmax(scores).reshape(P, 1).astype(jnp.float32)

    # ---- Pass 2: z = sum_p beta_p * embeds_p --------------------------------
    z_cost = pl.CostEstimate(
        flops=int(2 * P * N * D),
        transcendentals=0,
        bytes_accessed=int(4 * ((P + 1) * N * D + P)),
    )
    z = pl.pallas_call(
        _weighted_sum_kernel,
        out_shape=jax.ShapeDtypeStruct((N, D), jnp.float32),
        grid_spec=pltpu.PrefetchScalarGridSpec(
            num_scalar_prefetch=0,
            grid=(num_tiles,),
            in_specs=[
                pl.BlockSpec(memory_space=pltpu.MemorySpace.SMEM),   # beta scalars
                pl.BlockSpec((P, tile_n, D), lambda i: (0, i, 0)),   # embeds tile
            ],
            out_specs=pl.BlockSpec((tile_n, D), lambda i: (i, 0)),
        ),
        compiler_params=pltpu.CompilerParams(
            dimension_semantics=("parallel",),
            vmem_limit_bytes=_VMEM_LIMIT_BYTES),
        cost_estimate=z_cost,
    )(beta, embeds)

    return z


def aggregator_reference(embeds, fc_weight, fc_bias, att):
    """Pure-JAX reference mirroring the PyTorch forward."""
    sp = jnp.tanh(embeds @ fc_weight.T + fc_bias).mean(axis=1)   # (P, D)
    beta = att @ sp.T                                            # (1, P)
    beta = jax.nn.softmax(beta, axis=1).reshape(-1, 1, 1)        # (P, 1, 1)
    return (beta * embeds).sum(axis=0)                           # (N, D)


def init_params(key, hidden_dim):
    """Deterministic xavier_normal_(gain=1.414) init, matching the module shapes."""
    k_w, k_b, k_a = jax.random.split(key, 3)
    gain = 1.414
    std_w = gain * (2.0 / (hidden_dim + hidden_dim)) ** 0.5
    fc_weight = std_w * jax.random.normal(k_w, (hidden_dim, hidden_dim), jnp.float32)
    bound = 1.0 / (hidden_dim ** 0.5)   # torch default Linear bias init
    fc_bias = jax.random.uniform(k_b, (hidden_dim,), jnp.float32, -bound, bound)
    std_a = gain * (2.0 / (1 + hidden_dim)) ** 0.5
    att = std_a * jax.random.normal(k_a, (1, hidden_dim), jnp.float32)
    return fc_weight, fc_bias, att


if __name__ == "__main__":
    key = jax.random.PRNGKey(0)
    k_params, k_x, k2_params, k2_x = jax.random.split(key, 4)

    # --- primary check at the module's toy shape -----------------------------
    P, N, D = 3, 8, 32   # (num views, num nodes, hidden_dim)
    fc_weight, fc_bias, att = init_params(k_params, D)
    embeds = jax.random.normal(k_x, (P, N, D), jnp.float32)

    z = jax.block_until_ready(aggregator_forward(embeds, fc_weight, fc_bias, att))
    z_ref = aggregator_reference(embeds, fc_weight, fc_bias, att)
    assert z.shape == (N, D)
    # bf16 MXU inputs (f32 accumulation) -> loosened tolerance vs f32 reference.
    assert jnp.allclose(z, z_ref, atol=1e-2, rtol=1e-2), "mismatch vs reference (toy shape)"

    # --- secondary check exercising the tiled / ragged-tail path -------------
    P2, N2, D2 = 3, 300, 64
    fc_w2, fc_b2, att2 = init_params(k2_params, D2)
    embeds2 = jax.random.normal(k2_x, (P2, N2, D2), jnp.float32)

    z2 = jax.block_until_ready(
        aggregator_forward(embeds2, fc_w2, fc_b2, att2, tile_n=128))
    z2_ref = aggregator_reference(embeds2, fc_w2, fc_b2, att2)
    assert z2.shape == (N2, D2)
    assert jnp.allclose(z2, z2_ref, atol=1e-2, rtol=1e-2), "mismatch vs reference (ragged tiled path)"

    print("KERNEL_OK")
</pallas_src>

<mosaic_0001>
module attributes {stable_mosaic.version = 11 : i64} {
  func.func @_scores_kernel(%arg0: i32, %arg1: memref<3x8x32xf32, #tpu.memory_space<vmem>>, %arg2: memref<32x32xbf16, #tpu.memory_space<vmem>>, %arg3: memref<1x32xf32, #tpu.memory_space<vmem>>, %arg4: memref<1x32xf32, #tpu.memory_space<vmem>>, %arg5: memref<1x3x1xf32, #tpu.memory_space<vmem>>) attributes {dimension_semantics = [#tpu.dimension_semantics<parallel>], iteration_bounds = array<i64: 1>, scalar_prefetch = 0 : i64, scratch_operands = 0 : i64, tpu.core_type = #tpu.core_type<tc>, window_params = [{transform_indices = @transform_0, window_bounds = array<i64: 3, 8, 32>}, {pipeline_mode = #tpu.pipeline_mode<synchronous>, transform_indices = @transform_1, window_bounds = array<i64: 32, 32>}, {pipeline_mode = #tpu.pipeline_mode<synchronous>, transform_indices = @transform_2, window_bounds = array<i64: 1, 32>}, {pipeline_mode = #tpu.pipeline_mode<synchronous>, transform_indices = @transform_3, window_bounds = array<i64: 1, 32>}, {transform_indices = @transform_4, window_bounds = array<i64: 1, 3, 1>}]} {
    %c0 = arith.constant 0 : index
    %c0_0 = arith.constant 0 : index
    %c0_1 = arith.constant 0 : index
    %0 = vector.load %arg1[%c0, %c0_0, %c0_1] : memref<3x8x32xf32, #tpu.memory_space<vmem>>, vector<3x8x32xf32>
    %1 = arith.truncf %0 : vector<3x8x32xf32> to vector<3x8x32xbf16>
    %2 = vector.shape_cast %1 : vector<3x8x32xbf16> to vector<24x32xbf16>
    %c0_2 = arith.constant 0 : index
    %c0_3 = arith.constant 0 : index
    %3 = vector.load %arg2[%c0_2, %c0_3] : memref<32x32xbf16, #tpu.memory_space<vmem>>, vector<32x32xbf16>
    %cst = arith.constant dense<0.000000e+00> : vector<24x32xf32>
    %4 = tpu.matmul %2, %3, %cst {dimension_numbers = #tpu.dot_dimension_numbers<[1], [0], [0], [1], [0, 0, 1, 1], [], []>} : vector<24x32xbf16>, vector<32x32xbf16>, vector<24x32xf32> -> vector<24x32xf32>
    %c0_4 = arith.constant 0 : index
    %c0_5 = arith.constant 0 : index
    %5 = vector.load %arg3[%c0_4, %c0_5] : memref<1x32xf32, #tpu.memory_space<vmem>>, vector<1x32xf32>
    %6 = vector.broadcast %5 : vector<1x32xf32> to vector<24x32xf32>
    %7 = arith.addf %4, %6 : vector<24x32xf32>
    %8 = math.tanh %7 : vector<24x32xf32>
    %9 = vector.shape_cast %8 : vector<24x32xf32> to vector<3x8x32xf32>
    %c0_6 = arith.constant 0 : index
    %c0_7 = arith.constant 0 : index
    %10 = vector.load %arg4[%c0_6, %c0_7] : memref<1x32xf32, #tpu.memory_space<vmem>>, vector<1x32xf32>
    %11 = vector.shape_cast %10 : vector<1x32xf32> to vector<1x1x32xf32>
    %12 = vector.broadcast %11 : vector<1x1x32xf32> to vector<3x8x32xf32>
    %13 = arith.mulf %9, %12 : vector<3x8x32xf32>
    %cst_8 = arith.constant dense<0.000000e+00> : vector<3x32xf32>
    %14 = vector.multi_reduction <add>, %13, %cst_8 [1] : vector<3x8x32xf32> to vector<3x32xf32>
    %cst_9 = arith.constant dense<0.000000e+00> : vector<3xf32>
    %15 = vector.multi_reduction <add>, %14, %cst_9 [1] : vector<3x32xf32> to vector<3xf32>
    %16 = vector.shape_cast %15 : vector<3xf32> to vector<3x1xf32>
    %17 = vector.shape_cast %16 : vector<3x1xf32> to vector<1x3x1xf32>
    %c0_10 = arith.constant 0 : index
    %c0_11 = arith.constant 0 : index
    %c0_12 = arith.constant 0 : index
    %18 = vector.load %arg5[%c0_10, %c0_11, %c0_12] : memref<1x3x1xf32, #tpu.memory_space<vmem>>, vector<1x3x1xf32>
    tpu.vector_store %arg5[%c0_10, %c0_11, %c0_12], %17 {strides = array<i32>} : memref<1x3x1xf32, #tpu.memory_space<vmem>>, vector<1x3x1xf32>,
    return
  }
  func.func @transform_0(%arg0: i32) -> (i32, i32, i32) {
    %c0_i32 = arith.constant 0 : i32
    %c0_i32_0 = arith.constant 0 : i32
    %c0_i32_1 = arith.constant 0 : i32
    return %c0_i32, %arg0, %c0_i32_0 : i32, i32, i32
  }
  func.func @transform_1(%arg0: i32) -> (i32, i32) {
    %c0_i32 = arith.constant 0 : i32
    %c0_i32_0 = arith.constant 0 : i32
    %c0_i32_1 = arith.constant 0 : i32
    return %c0_i32, %c0_i32_0 : i32, i32
  }
  func.func @transform_2(%arg0: i32) -> (i32, i32) {
    %c0_i32 = arith.constant 0 : i32
    %c0_i32_0 = arith.constant 0 : i32
    %c0_i32_1 = arith.constant 0 : i32
    return %c0_i32, %c0_i32_0 : i32, i32
  }
  func.func @transform_3(%arg0: i32) -> (i32, i32) {
    %c0_i32 = arith.constant 0 : i32
    %c0_i32_0 = arith.constant 0 : i32
    %c0_i32_1 = arith.constant 0 : i32
    return %c0_i32, %c0_i32_0 : i32, i32
  }
  func.func @transform_4(%arg0: i32) -> (i32, i32, i32) {
    %c0_i32 = arith.constant 0 : i32
    %c0_i32_0 = arith.constant 0 : i32
    %c0_i32_1 = arith.constant 0 : i32
    return %arg0, %c0_i32, %c0_i32_0 : i32, i32, i32
  }
}

</mosaic_0001>

<bundles_post_ra>
// kernel: tpu_custom_call.1
= control target key start
LH: loop header
LB: loop body
LE: loop exit
PB: predicated region body
PF: predicated region fallthrough
CT: control target
= control target key end

     0   :  { %9 = vsyncpa [#allocation3], 0  ;;  %s345_s0 = inlined_call_operand.hbm [shape: f32[3,8,32], index: 0, kind: input, shape index: {}]   ;;  %s346_s1 = inlined_call_operand.hbm [shape: bf16[32,32], index: 1, kind: input, shape index: {}]   ;;  %s347_s2 = inlined_call_operand.vmem [shape: f32[1,32], index: 2, kind: input, shape index: {}]   ;;  %s348_s3 = inlined_call_operand.vmem [shape: f32[1,32], index: 3, kind: input, shape index: {}]   ;;  %s349_s4 = inlined_call_operand.vmem [shape: f32[1,3,1], index: 4, kind: output, shape index: {}]  }
   0x1   :  { %10 = vsyncpa [#allocation5], 0  ;;  %s276_s15 = smov [#allocation2]   ;;  %s228_s19 = scalar_lea.hbm %s345_s0, 384 }
   0x2   :  { %s16_s16 = sshll.u32 %s276_s15, 4  ;;  %p229_p0 = scmp.ne.s32.totalorder %s345_s0, %s228_s19  ;;  %s17_s16 = int_to_ptr.vmem [resolvable:$true] %s16_s16 }
   0x3   :  { %p232_p1 = scmp.lt.u32.totalorder %s228_s19, %s345_s0 }
   0x5   :  { %p234_p2 = pnand %p232_p1, %p229_p0 }
   0x7   :  { %237 = shalt.err (!%p234_p2)
}
   0x8   :  { %s238_s24 = scalar_lea.vmem %s17_s16, 384  ;;  %p243_p4 = scmp.lt.s32.totalorder %s17_s16, %s17_s16 }
   0x9   :  { %p239_p3 = scmp.ne.s32.totalorder %s17_s16, %s238_s24  ;;  %p244_p5 = scmp.lt.s32.totalorder %s238_s24, %s238_s24 }
   0xb   :  { %p245_p6 = por %p244_p5, %p243_p4 }
   0xd   :  { %p246_p7 = pnand %p245_p6, %p239_p3 }
   0xf   :  { %249 = shalt.err (!%p246_p7)
}
  0x10   :  { %s277_s25 = smov 128   ;;  %s278_s26 = smov 8  }
  0x11   :  { %22 = dma.hbm_to_vmem [thread:$0]  %s345_s0, 384, %s17_s16, [#allocation3], %s277_s25, %s277_s25, %s278_s26  }
  0x12   :  { %s279_s29 = smov [#allocation4]   ;;  %s250_s7 = scalar_lea.hbm %s346_s1, 256 }
  0x13   :  { %s28_s30 = sshll.u32 %s279_s29, 4  ;;  %p251_p8 = scmp.ne.s32.totalorder %s346_s1, %s250_s7  ;;  %s29_s30 = int_to_ptr.vmem [resolvable:$true] %s28_s30 }
  0x14   :  { %p254_p9 = scmp.lt.u32.totalorder %s250_s7, %s346_s1 }
  0x16   :  { %p256_p10 = pnand %p254_p9, %p251_p8 }
  0x18   :  { %259 = shalt.err (!%p256_p10)
}
  0x19   :  { %s260_s12 = scalar_lea.vmem %s29_s30, 256  ;;  %p265_p12 = scmp.lt.s32.totalorder %s29_s30, %s29_s30 }
  0x1a   :  { %p261_p11 = scmp.ne.s32.totalorder %s29_s30, %s260_s12  ;;  %p266_p13 = scmp.lt.s32.totalorder %s260_s12, %s260_s12 }
  0x1c   :  { %p267_p0 = por %p266_p13, %p265_p12 }
  0x1e   :  { %p268_p1 = pnand %p267_p0, %p261_p11 }
  0x20   :  { %271 = shalt.err (!%p268_p1)
}
  0x21   :  { %s280_s0 = smov 64   ;;  %s281_s13 = smov 4  }
  0x22   :  { %34 = dma.hbm_to_vmem [thread:$0]  %s346_s1, 256, %s29_s30, [#allocation5], %s280_s0, %s280_s0, %s281_s13  }
  0x23   :  { %272 = dma.done.wait [#allocation3], 384  }
  0x24   :  { %273 = vsyncadd [#allocation3], 4294966912 }
  0x25   :  { %274 = dma.done.wait [#allocation5], 256  }
  0x26   :  { %275 = vsyncadd [#allocation5], 4294967040  ;;  %v220_v0 = vld [vmem:[#allocation4] sm:$0xff]   ;;  %v221_v1 = vld [vmem:[#allocation4 + $0x8] sm:$0xff]   ;;  %vm83_vm0 = vcmask 261120   ;;  %vm175_vm1 = vcmask 1041409  }
  0x27   :  { %206 = vmatprep.subr.bf16.mxu0 %v220_v0  ;;  %v46_v2 = vld [vmem:[#allocation2] sm:$0xff]  ;;  %v47_v3 = vld [vmem:[#allocation2 + $0x8] sm:$0xff]  ;;  %v48_v5 = vld [vmem:[#allocation2 + $0x10] sm:$0xff]  ;;  %vm177_vm2 = vcmask 1042434   ;;  %vm180_vm3 = vcmask 256000   ;;  %vm184_vm4 = vcmask 2048  }
  0x28   :  { %207 = vmatpush3.bf16.msra.mxu0 %v220_v0  ;;  %v200_v4 = vpack.c.bf16 %v47_v3, %v46_v2  ;;  %v201_v6 = vpack.c.bf16 %v48_v5, %v48_v5  ;;  %v192_v7 = vld [vmem:[%s347_s2] ss:$0 sm:$0xff] }
  0x29   :  { %208 = vmatprep.subr.bf16.mxu0 %v221_v1  ;;  %v199_v15 = vld [vmem:[%s348_s3] ss:$0 sm:$0xff] }
  0x2a   :  { %210 = vmatprep.mubr.msk.bf16.mxu0 %vm83_vm0, %v200_v4 }
  0x2c   :  { %209 = vmatpush3.bf16.msra.mxu0 %v221_v1 }
  0x2f   :  { %211 = vmatmul.mubr.msk.bf16.vlgmr.msra.gmra.mrb[0].mxu0 %vm83_vm0, %v201_v6 }
 0x102   :  { %v212_v8 = vpop.f32.mrb[0].mxu0 }
 0x103   :  { %v133_v9 = vadd.f32 %v212_v8, %v192_v7  ;;  %v124_v10 = vpop.f32.mrb[1].mxu0 }
 0x104   :  { %v125_v11 = vadd.f32 %v192_v7, %v124_v10  ;;  %v213_v12 = vpop.f32.mrb[2].mxu0 }
 0x105   :  { %222 = vtanh.f32 %v133_v9  ;;  %v127_v13 = vpop.f32.mrb[3].mxu0 }
 0x106   :  { %224 = vtanh.f32 %v125_v11  ;;  %v128_v14 = vadd.f32 %v192_v7, %v127_v13 }
 0x108   :  { %226 = vtanh.f32 %v128_v14 }
 0x10f   :  { %v223_v16 = vpop.eup %222 }
 0x110   :  { %v225_v17 = vpop.eup %224  ;;  %v150_v18 = vmul.f32 %v223_v16, %v199_v15 }
 0x111   :  { %v148_v19 = vmul.f32 %v225_v17, %v199_v15 }
 0x112   :  { %v227_v20 = vpop.eup %226  ;;  %v165_v21 = vsel %vm83_vm0, %v150_v18, 0.0 }
 0x113   :  { %v149_v22 = vmul.f32 %v227_v20, %v199_v15  ;;  %v151_v23 = vsel %vm83_vm0, %v148_v19, 0.0  ;;  %v166_v24 = vrot.slane %v165_v21, 4 }
 0x114   :  { %v152_v25 = vrot.slane %v151_v23, 4 }
 0x115   :  { %v158_v26 = vsel %vm83_vm0, %v149_v22, 0.0  ;;  %v167_v27 = vadd.f32 %v166_v24, %v165_v21 }
 0x116   :  { %v153_v28 = vadd.f32 %v152_v25, %v151_v23  ;;  %v159_v29 = vrot.slane %v158_v26, 4 }
 0x117   :  { %v168_v30 = vrot.slane %v167_v27, 2 }
 0x118   :  { %v154_v31 = vrot.slane %v153_v28, 2  ;;  %v160_v32 = vadd.f32 %v159_v29, %v158_v26 }
 0x119   :  { %v169_v33 = vadd.f32 %v168_v30, %v167_v27 }
 0x11a   :  { %v155_v34 = vadd.f32 %v154_v31, %v153_v28  ;;  %v161_v35 = vrot.slane %v160_v32, 2 }
 0x11b   :  { %v170_v38 = vrot.slane %v169_v33, 1 }
 0x11c   :  { %v156_v36 = vrot.slane %v155_v34, 1  ;;  %v162_v37 = vadd.f32 %v161_v35, %v160_v32 }
 0x11d   :  { %v171_v42 = vadd.f32 %v170_v38, %v169_v33 }
 0x11e   :  { %v163_v39 = vrot.slane %v162_v37, 1  ;;  %v157_v40 = vadd.f32 %v156_v36, %v155_v34 }
 0x120   :  { %v164_v41 = vadd.f32 %v163_v39, %v162_v37 }
 0x122   :  { %v176_v43 = vsel %vm175_vm1, %v164_v41, %v157_v40 }
 0x123   :  { %v178_v44 = vsel %vm177_vm2, %v171_v42, %v176_v43 }
 0x124   :  { %v181_v45 = vsel %vm180_vm3, %v178_v44, 0.0 }
 0x125   :  { %182 = vadd.xlane.f32.xlu0 %v181_v45 }
 0x1b2   :  { %v183_v46 = vpop.xlane.xlu0 %182 }
 0x1b3   :  { %185 = vst.msk [vmem:[%s349_s4] sm:$0x7] %vm184_vm4, %v183_v46 }
 0x1b4   :  { %190 = vsyncpa [#allocation3], 1 }
 0x1b5   :  { %191 = vsyncpa [#allocation5], 1 }

</bundles_post_ra>
